<compile_context>
chip_gen: v5e
topology: v5e:2x2
jax: 0.10.0
libtpu: 0.0.40
codegen_flags: <defaults>
</compile_context>

<pallas_src>
import numpy as np
import jax
import jax.numpy as jnp
from jax import lax
from jax.experimental import pallas as pl
from jax.experimental.pallas import tpu as pltpu

H = 100          # hidden size (module hard-codes 100)
H_PAD = 128      # lane-padded hidden size
N_CLASSES = 10
OUT_PAD = 128    # lane-padded output size
T = 784          # 28*28, the module's forward loops exactly 784 steps
T_CHUNK = 196    # 784 = 4 * 196; u pipelined in (T_CHUNK, b_tile, 128) bf16 blocks
UNROLL = 7       # manual unroll of the serial time loop (196 = 28 * 7)


def recurrent_mnist_kernel(u_ref, whT_ref, woT_ref, bo_ref, out_ref, curr_ref):
    """u_ref:   (T_CHUNK, b_tile, H_PAD) bf16   precomputed bh + x[:, t] * wi
       whT_ref: (H_PAD, H_PAD)          bf16   state_dense.weight^T (padded)
       woT_ref: (H_PAD, OUT_PAD)        bf16   output.weight^T (padded)
       bo_ref:  (1, OUT_PAD)            f32    output.bias (padded)
       out_ref: (b_tile, OUT_PAD)       f32    logits (padded)
       curr_ref:(b_tile, H_PAD)         f32    hidden state, carried across time chunks"""
    t_chunk = pl.program_id(1)

    @pl.when(t_chunk == 0)
    def _():
        curr_ref[...] = jnp.zeros_like(curr_ref)

    whT = whT_ref[...]                                   # loop-invariant RHS, held in vregs
    # TODO(synk): if the bundle dump shows the RHS push re-issued every step,
    # switch to explicit pltpu.matmul_push_rhs / matmul_acc_lhs / matmul_pop.

    def body(j, curr):
        base = j * UNROLL
        for k in range(UNROLL):                          # manual unroll (LLO visibility)
            u = u_ref[base + k].astype(jnp.float32)      # contiguous bf16 slab load, f32 add
            new = jnp.dot(curr.astype(jnp.bfloat16), whT,
                          preferred_element_type=jnp.float32) + u
            curr = jnp.tanh(new)                         # before/act/after = id / tanh / id
        return curr

    curr = lax.fori_loop(0, T_CHUNK // UNROLL, body, curr_ref[...])
    curr_ref[...] = curr                                 # carry to the next time chunk

    @pl.when(t_chunk == pl.num_programs(1) - 1)
    def _():
        # Epilogue reuses the fori_loop carry directly; bf16 operands -> single MXU pass.
        out_ref[...] = (jnp.dot(curr.astype(jnp.bfloat16), woT_ref[...],
                                preferred_element_type=jnp.float32)
                        + bo_ref[...])


def make_params(key):
    """Deterministic parameter init mirroring the module's __init__."""
    k_wi, k_wo = jax.random.split(key, 2)
    wi = 0.001 * jax.random.normal(k_wi, (H, 1), jnp.float32)   # input_dense.weight
    wh = jnp.eye(H, dtype=jnp.float32)                          # state_dense.weight
    bh = jnp.zeros((H,), jnp.float32)                           # state_dense.bias
    xavier_std = float(np.sqrt(2.0 / (H + N_CLASSES)))
    wo = xavier_std * jax.random.normal(k_wo, (N_CLASSES, H), jnp.float32)
    bo = jnp.zeros((N_CLASSES,), jnp.float32)
    return wi, wh, bh, wo, bo


def _round_up(n, m):
    return ((n + m - 1) // m) * m


def recurrent_mnist_forward(x, order, params, *, b_tile=None, allow_input_fusion=True):
    wi, wh, bh, wo, bo = params
    B = x.shape[0]
    if b_tile is None:
        # The recurrence is latency-bound; LHS rows up to the MXU height are
        # essentially free.  Cap at 128 so that on v7x the "parallel" batch axis
        # splits B >= 256 across the two TensorCores.  On v6e with B >= 256,
        # pass b_tile=256 to fill the 2x256 MXU (bf16 u keeps the double-buffered
        # block within the 32 MiB scoped-VMEM budget).
        b_tile = min(128, _round_up(max(B, 1), 8))
    B_PAD = _round_up(B, b_tile)

    x_flat = x.reshape(B, -1)[:, order].astype(jnp.float32)         # (B, T) permuted pixels
    x_pad = jnp.zeros((B_PAD, T), jnp.float32).at[:B].set(x_flat)

    # Hoist the per-step input math out of the serial loop:
    #   u[t, b, h] = bh[h] + x[b, t] * wi[h]
    # Stored bf16 (halves HBM + VMEM).  With allow_input_fusion, XLA may fuse
    # this rank-1-broadcast producer into the pallas input so the 128x-expanded
    # u never round-trips through HBM.
    wi_pad = jnp.zeros((H_PAD,), jnp.float32).at[:H].set(wi[:, 0])
    bh_pad = jnp.zeros((H_PAD,), jnp.float32).at[:H].set(bh)
    u = (x_pad.T[:, :, None] * wi_pad[None, None, :]
         + bh_pad[None, None, :]).astype(jnp.bfloat16)               # (T, B_PAD, H_PAD)

    whT_pad = (jnp.zeros((H_PAD, H_PAD), jnp.float32)
               .at[:H, :H].set(wh.T).astype(jnp.bfloat16))
    woT_pad = (jnp.zeros((H_PAD, OUT_PAD), jnp.float32)
               .at[:H, :N_CLASSES].set(wo.T).astype(jnp.bfloat16))
    bo_pad = jnp.zeros((1, OUT_PAD), jnp.float32).at[0, :N_CLASSES].set(bo)

    grid = (B_PAD // b_tile, T // T_CHUNK)

    out_pad = pl.pallas_call(
        recurrent_mnist_kernel,
        out_shape=jax.ShapeDtypeStruct((B_PAD, OUT_PAD), jnp.float32),
        grid_spec=pltpu.PrefetchScalarGridSpec(
            num_scalar_prefetch=0,
            grid=grid,
            in_specs=[
                pl.BlockSpec((T_CHUNK, b_tile, H_PAD), lambda b, t: (t, b, 0)),
                pl.BlockSpec((H_PAD, H_PAD), lambda b, t: (0, 0)),
                pl.BlockSpec((H_PAD, OUT_PAD), lambda b, t: (0, 0)),
                pl.BlockSpec((1, OUT_PAD), lambda b, t: (0, 0)),
            ],
            out_specs=pl.BlockSpec((b_tile, OUT_PAD), lambda b, t: (b, 0)),
            scratch_shapes=[pltpu.VMEM((b_tile, H_PAD), jnp.float32)],
        ),
        compiler_params=pltpu.CompilerParams(
            dimension_semantics=("parallel", "arbitrary"),
            vmem_limit_bytes=32 * 1024 * 1024,
            allow_input_fusion=(
                [True, False, False, False] if allow_input_fusion else None),
        ),
    )(u, whT_pad, woT_pad, bo_pad)

    return out_pad[:B, :N_CLASSES]


def reference_forward(x, order, params):
    """Pure-JAX f32 reference matching the PyTorch forward."""
    wi, wh, bh, wo, bo = params
    B = x.shape[0]
    xf = x.reshape(B, -1)[:, order].astype(jnp.float32)

    def step(curr, xt):
        new = curr @ wh.T + bh + xt[:, None] @ wi.T
        return jnp.tanh(new), None

    curr, _ = lax.scan(step, jnp.zeros((B, H), jnp.float32), xf.T)
    return curr @ wo.T + bo


def reference_forward_bf16(x, order, params):
    """Precision-matched reference: bf16 matmul operands and bf16-rounded u,
    f32 accumulation / tanh, bf16-operand epilogue -- mirrors the kernel."""
    wi, wh, bh, wo, bo = params
    B = x.shape[0]
    xf = x.reshape(B, -1)[:, order].astype(jnp.float32)
    whT_bf16 = wh.T.astype(jnp.bfloat16)
    woT_bf16 = wo.T.astype(jnp.bfloat16)

    def step(curr, xt):
        u = (xt[:, None] * wi[:, 0] + bh).astype(jnp.bfloat16).astype(jnp.float32)
        new = jnp.dot(curr.astype(jnp.bfloat16), whT_bf16,
                      preferred_element_type=jnp.float32) + u
        return jnp.tanh(new), None

    curr, _ = lax.scan(step, jnp.zeros((B, H), jnp.float32), xf.T)
    return (jnp.dot(curr.astype(jnp.bfloat16), woT_bf16,
                    preferred_element_type=jnp.float32) + bo)


if __name__ == "__main__":
    key = jax.random.PRNGKey(0)
    k_x, k_ord, k_par = jax.random.split(key, 3)

    x = jax.random.normal(k_x, (2, 1, 28, 28), jnp.float32)   # MNIST-shaped input
    order = jax.random.permutation(k_ord, T)                  # pixel processing order
    params = make_params(k_par)

    try:
        out = jax.block_until_ready(recurrent_mnist_forward(x, order, params))
    except Exception:
        # Fallback for toolchain versions where fusing the u producer into the
        # Mosaic call is unsupported; identical math, u simply materialized (bf16).
        out = jax.block_until_ready(
            recurrent_mnist_forward(x, order, params, allow_input_fusion=False))
    assert out.shape == (2, N_CLASSES)

    # Precision-matched reference (same bf16 roundings as the kernel).
    ref_bf16 = jax.block_until_ready(reference_forward_bf16(x, order, params))
    np.testing.assert_allclose(np.asarray(out), np.asarray(ref_bf16),
                               rtol=1e-3, atol=1e-3)

    # Full-f32 reference matching the PyTorch module (looser tolerance because
    # the kernel's recurrent matmul / input term use bf16 operands).
    ref_f32 = jax.block_until_ready(reference_forward(x, order, params))
    np.testing.assert_allclose(np.asarray(out), np.asarray(ref_f32),
                               rtol=5e-2, atol=5e-2)

    print("KERNEL_OK")
</pallas_src>

<mosaic_0001>
module attributes {stable_mosaic.version = 11 : i64} {
  func.func @recurrent_mnist_kernel(%arg0: i32, %arg1: i32, %arg2: memref<196x8x128xbf16, #tpu.memory_space<vmem>>, %arg3: memref<128x128xbf16, #tpu.memory_space<vmem>>, %arg4: memref<128x128xbf16, #tpu.memory_space<vmem>>, %arg5: memref<1x128xf32, #tpu.memory_space<vmem>>, %arg6: memref<8x128xf32, #tpu.memory_space<vmem>>, %arg7: memref<8x128xf32, #tpu.memory_space<vmem>>) attributes {dimension_semantics = [#tpu.dimension_semantics<parallel>, #tpu.dimension_semantics<arbitrary>], iteration_bounds = array<i64: 1, 4>, scalar_prefetch = 0 : i64, scratch_operands = 1 : i64, tpu.core_type = #tpu.core_type<tc>, window_params = [{transform_indices = @transform_0, window_bounds = array<i64: 196, 8, 128>}, {pipeline_mode = #tpu.pipeline_mode<synchronous>, transform_indices = @transform_1, window_bounds = array<i64: 128, 128>}, {pipeline_mode = #tpu.pipeline_mode<synchronous>, transform_indices = @transform_2, window_bounds = array<i64: 128, 128>}, {pipeline_mode = #tpu.pipeline_mode<synchronous>, transform_indices = @transform_3, window_bounds = array<i64: 1, 128>}, {transform_indices = @transform_4, window_bounds = array<i64: 8, 128>}]} {
    %c0_i32 = arith.constant 0 : i32
    %0 = arith.cmpi eq, %arg1, %c0_i32 : i32
    %1 = arith.extui %0 : i1 to i32
    %c0_i32_0 = arith.constant 0 : i32
    %2 = arith.cmpi ne, %1, %c0_i32_0 : i32
    scf.if %2 {
      %cst = arith.constant 0.000000e+00 : f32
      %11 = vector.broadcast %cst : f32 to vector<8x128xf32>
      %c0_9 = arith.constant 0 : index
      %c0_10 = arith.constant 0 : index
      %12 = vector.load %arg7[%c0_9, %c0_10] : memref<8x128xf32, #tpu.memory_space<vmem>>, vector<8x128xf32>
      tpu.vector_store %arg7[%c0_9, %c0_10], %11 {strides = array<i32>} : memref<8x128xf32, #tpu.memory_space<vmem>>, vector<8x128xf32>,
    } else {
    }
    %c0 = arith.constant 0 : index
    %c0_1 = arith.constant 0 : index
    %3 = vector.load %arg3[%c0, %c0_1] : memref<128x128xbf16, #tpu.memory_space<vmem>>, vector<128x128xbf16>
    %c0_2 = arith.constant 0 : index
    %c0_3 = arith.constant 0 : index
    %4 = vector.load %arg7[%c0_2, %c0_3] : memref<8x128xf32, #tpu.memory_space<vmem>>, vector<8x128xf32>
    %c0_i32_4 = arith.constant 0 : i32
    %c28_i32 = arith.constant 28 : i32
    %5 = arith.addi %c0_i32_4, %c28_i32 : i32
    %c1_i32 = arith.constant 1 : i32
    %6 = scf.for %arg8 = %c0_i32_4 to %5 step %c1_i32 iter_args(%arg9 = %4) -> (vector<8x128xf32>)  : i32 {
      %c7_i32 = arith.constant 7 : i32
      %11 = arith.muli %arg8, %c7_i32 : i32
      %c0_i32_9 = arith.constant 0 : i32
      %12 = arith.addi %11, %c0_i32_9 : i32
      %13 = arith.index_cast %12 : i32 to index
      %c0_10 = arith.constant 0 : index
      %c0_11 = arith.constant 0 : index
      %14 = vector.load %arg2[%13, %c0_10, %c0_11] : memref<196x8x128xbf16, #tpu.memory_space<vmem>>, vector<1x8x128xbf16>
      %15 = vector.shape_cast %14 : vector<1x8x128xbf16> to vector<8x128xbf16>
      %16 = arith.extf %15 : vector<8x128xbf16> to vector<8x128xf32>
      %17 = arith.truncf %arg9 : vector<8x128xf32> to vector<8x128xbf16>
      %cst = arith.constant dense<0.000000e+00> : vector<8x128xf32>
      %18 = tpu.matmul %17, %3, %cst {dimension_numbers = #tpu.dot_dimension_numbers<[1], [0], [0], [1], [0, 0, 1, 1], [], []>} : vector<8x128xbf16>, vector<128x128xbf16>, vector<8x128xf32> -> vector<8x128xf32>
      %19 = arith.addf %18, %16 : vector<8x128xf32>
      %20 = math.tanh %19 : vector<8x128xf32>
      %c1_i32_12 = arith.constant 1 : i32
      %21 = arith.addi %11, %c1_i32_12 : i32
      %22 = arith.index_cast %21 : i32 to index
      %c0_13 = arith.constant 0 : index
      %c0_14 = arith.constant 0 : index
      %23 = vector.load %arg2[%22, %c0_13, %c0_14] : memref<196x8x128xbf16, #tpu.memory_space<vmem>>, vector<1x8x128xbf16>
      %24 = vector.shape_cast %23 : vector<1x8x128xbf16> to vector<8x128xbf16>
      %25 = arith.extf %24 : vector<8x128xbf16> to vector<8x128xf32>
      %26 = arith.truncf %20 : vector<8x128xf32> to vector<8x128xbf16>
      %cst_15 = arith.constant dense<0.000000e+00> : vector<8x128xf32>
      %27 = tpu.matmul %26, %3, %cst_15 {dimension_numbers = #tpu.dot_dimension_numbers<[1], [0], [0], [1], [0, 0, 1, 1], [], []>} : vector<8x128xbf16>, vector<128x128xbf16>, vector<8x128xf32> -> vector<8x128xf32>
      %28 = arith.addf %27, %25 : vector<8x128xf32>
      %29 = math.tanh %28 : vector<8x128xf32>
      %c2_i32 = arith.constant 2 : i32
      %30 = arith.addi %11, %c2_i32 : i32
      %31 = arith.index_cast %30 : i32 to index
      %c0_16 = arith.constant 0 : index
      %c0_17 = arith.constant 0 : index
      %32 = vector.load %arg2[%31, %c0_16, %c0_17] : memref<196x8x128xbf16, #tpu.memory_space<vmem>>, vector<1x8x128xbf16>
      %33 = vector.shape_cast %32 : vector<1x8x128xbf16> to vector<8x128xbf16>
      %34 = arith.extf %33 : vector<8x128xbf16> to vector<8x128xf32>
      %35 = arith.truncf %29 : vector<8x128xf32> to vector<8x128xbf16>
      %cst_18 = arith.constant dense<0.000000e+00> : vector<8x128xf32>
      %36 = tpu.matmul %35, %3, %cst_18 {dimension_numbers = #tpu.dot_dimension_numbers<[1], [0], [0], [1], [0, 0, 1, 1], [], []>} : vector<8x128xbf16>, vector<128x128xbf16>, vector<8x128xf32> -> vector<8x128xf32>
      %37 = arith.addf %36, %34 : vector<8x128xf32>
      %38 = math.tanh %37 : vector<8x128xf32>
      %c3_i32_19 = arith.constant 3 : i32
      %39 = arith.addi %11, %c3_i32_19 : i32
      %40 = arith.index_cast %39 : i32 to index
      %c0_20 = arith.constant 0 : index
      %c0_21 = arith.constant 0 : index
      %41 = vector.load %arg2[%40, %c0_20, %c0_21] : memref<196x8x128xbf16, #tpu.memory_space<vmem>>, vector<1x8x128xbf16>
      %42 = vector.shape_cast %41 : vector<1x8x128xbf16> to vector<8x128xbf16>
      %43 = arith.extf %42 : vector<8x128xbf16> to vector<8x128xf32>
      %44 = arith.truncf %38 : vector<8x128xf32> to vector<8x128xbf16>
      %cst_22 = arith.constant dense<0.000000e+00> : vector<8x128xf32>
      %45 = tpu.matmul %44, %3, %cst_22 {dimension_numbers = #tpu.dot_dimension_numbers<[1], [0], [0], [1], [0, 0, 1, 1], [], []>} : vector<8x128xbf16>, vector<128x128xbf16>, vector<8x128xf32> -> vector<8x128xf32>
      %46 = arith.addf %45, %43 : vector<8x128xf32>
      %47 = math.tanh %46 : vector<8x128xf32>
      %c4_i32 = arith.constant 4 : i32
      %48 = arith.addi %11, %c4_i32 : i32
      %49 = arith.index_cast %48 : i32 to index
      %c0_23 = arith.constant 0 : index
      %c0_24 = arith.constant 0 : index
      %50 = vector.load %arg2[%49, %c0_23, %c0_24] : memref<196x8x128xbf16, #tpu.memory_space<vmem>>, vector<1x8x128xbf16>
      %51 = vector.shape_cast %50 : vector<1x8x128xbf16> to vector<8x128xbf16>
      %52 = arith.extf %51 : vector<8x128xbf16> to vector<8x128xf32>
      %53 = arith.truncf %47 : vector<8x128xf32> to vector<8x128xbf16>
      %cst_25 = arith.constant dense<0.000000e+00> : vector<8x128xf32>
      %54 = tpu.matmul %53, %3, %cst_25 {dimension_numbers = #tpu.dot_dimension_numbers<[1], [0], [0], [1], [0, 0, 1, 1], [], []>} : vector<8x128xbf16>, vector<128x128xbf16>, vector<8x128xf32> -> vector<8x128xf32>
      %55 = arith.addf %54, %52 : vector<8x128xf32>
      %56 = math.tanh %55 : vector<8x128xf32>
      %c5_i32 = arith.constant 5 : i32
      %57 = arith.addi %11, %c5_i32 : i32
      %58 = arith.index_cast %57 : i32 to index
      %c0_26 = arith.constant 0 : index
      %c0_27 = arith.constant 0 : index
      %59 = vector.load %arg2[%58, %c0_26, %c0_27] : memref<196x8x128xbf16, #tpu.memory_space<vmem>>, vector<1x8x128xbf16>
      %60 = vector.shape_cast %59 : vector<1x8x128xbf16> to vector<8x128xbf16>
      %61 = arith.extf %60 : vector<8x128xbf16> to vector<8x128xf32>
      %62 = arith.truncf %56 : vector<8x128xf32> to vector<8x128xbf16>
      %cst_28 = arith.constant dense<0.000000e+00> : vector<8x128xf32>
      %63 = tpu.matmul %62, %3, %cst_28 {dimension_numbers = #tpu.dot_dimension_numbers<[1], [0], [0], [1], [0, 0, 1, 1], [], []>} : vector<8x128xbf16>, vector<128x128xbf16>, vector<8x128xf32> -> vector<8x128xf32>
      %64 = arith.addf %63, %61 : vector<8x128xf32>
      %65 = math.tanh %64 : vector<8x128xf32>
      %c6_i32 = arith.constant 6 : i32
      %66 = arith.addi %11, %c6_i32 : i32
      %67 = arith.index_cast %66 : i32 to index
      %c0_29 = arith.constant 0 : index
      %c0_30 = arith.constant 0 : index
      %68 = vector.load %arg2[%67, %c0_29, %c0_30] : memref<196x8x128xbf16, #tpu.memory_space<vmem>>, vector<1x8x128xbf16>
      %69 = vector.shape_cast %68 : vector<1x8x128xbf16> to vector<8x128xbf16>
      %70 = arith.extf %69 : vector<8x128xbf16> to vector<8x128xf32>
      %71 = arith.truncf %65 : vector<8x128xf32> to vector<8x128xbf16>
      %cst_31 = arith.constant dense<0.000000e+00> : vector<8x128xf32>
      %72 = tpu.matmul %71, %3, %cst_31 {dimension_numbers = #tpu.dot_dimension_numbers<[1], [0], [0], [1], [0, 0, 1, 1], [], []>} : vector<8x128xbf16>, vector<128x128xbf16>, vector<8x128xf32> -> vector<8x128xf32>
      %73 = arith.addf %72, %70 : vector<8x128xf32>
      %74 = math.tanh %73 : vector<8x128xf32>
      scf.yield %74 : vector<8x128xf32>
    }
    %c28_i32_5 = arith.constant 28 : i32
    %c0_6 = arith.constant 0 : index
    %c0_7 = arith.constant 0 : index
    %7 = vector.load %arg7[%c0_6, %c0_7] : memref<8x128xf32, #tpu.memory_space<vmem>>, vector<8x128xf32>
    tpu.vector_store %arg7[%c0_6, %c0_7], %6 {strides = array<i32>} : memref<8x128xf32, #tpu.memory_space<vmem>>, vector<8x128xf32>,
    %c3_i32 = arith.constant 3 : i32
    %8 = arith.cmpi eq, %arg1, %c3_i32 : i32
    %9 = arith.extui %8 : i1 to i32
    %c0_i32_8 = arith.constant 0 : i32
    %10 = arith.cmpi ne, %9, %c0_i32_8 : i32
    scf.if %10 {
      %11 = arith.truncf %6 : vector<8x128xf32> to vector<8x128xbf16>
      %c0_9 = arith.constant 0 : index
      %c0_10 = arith.constant 0 : index
      %12 = vector.load %arg4[%c0_9, %c0_10] : memref<128x128xbf16, #tpu.memory_space<vmem>>, vector<128x128xbf16>
      %cst = arith.constant dense<0.000000e+00> : vector<8x128xf32>
      %13 = tpu.matmul %11, %12, %cst {dimension_numbers = #tpu.dot_dimension_numbers<[1], [0], [0], [1], [0, 0, 1, 1], [], []>} : vector<8x128xbf16>, vector<128x128xbf16>, vector<8x128xf32> -> vector<8x128xf32>
      %c0_11 = arith.constant 0 : index
      %c0_12 = arith.constant 0 : index
      %14 = vector.load %arg5[%c0_11, %c0_12] : memref<1x128xf32, #tpu.memory_space<vmem>>, vector<1x128xf32>
      %15 = vector.broadcast %14 : vector<1x128xf32> to vector<8x128xf32>
      %16 = arith.addf %13, %15 : vector<8x128xf32>
      %c0_13 = arith.constant 0 : index
      %c0_14 = arith.constant 0 : index
      %17 = vector.load %arg6[%c0_13, %c0_14] : memref<8x128xf32, #tpu.memory_space<vmem>>, vector<8x128xf32>
      tpu.vector_store %arg6[%c0_13, %c0_14], %16 {strides = array<i32>} : memref<8x128xf32, #tpu.memory_space<vmem>>, vector<8x128xf32>,
    } else {
    }
    return
  }
  func.func @transform_0(%arg0: i32, %arg1: i32) -> (i32, i32, i32) {
    %c0_i32 = arith.constant 0 : i32
    %c0_i32_0 = arith.constant 0 : i32
    return %arg1, %arg0, %c0_i32 : i32, i32, i32
  }
  func.func @transform_1(%arg0: i32, %arg1: i32) -> (i32, i32) {
    %c0_i32 = arith.constant 0 : i32
    %c0_i32_0 = arith.constant 0 : i32
    %c0_i32_1 = arith.constant 0 : i32
    return %c0_i32, %c0_i32_0 : i32, i32
  }
  func.func @transform_2(%arg0: i32, %arg1: i32) -> (i32, i32) {
    %c0_i32 = arith.constant 0 : i32
    %c0_i32_0 = arith.constant 0 : i32
    %c0_i32_1 = arith.constant 0 : i32
    return %c0_i32, %c0_i32_0 : i32, i32
  }
  func.func @transform_3(%arg0: i32, %arg1: i32) -> (i32, i32) {
    %c0_i32 = arith.constant 0 : i32
    %c0_i32_0 = arith.constant 0 : i32
    %c0_i32_1 = arith.constant 0 : i32
    return %c0_i32, %c0_i32_0 : i32, i32
  }
  func.func @transform_4(%arg0: i32, %arg1: i32) -> (i32, i32) {
    %c0_i32 = arith.constant 0 : i32
    %c0_i32_0 = arith.constant 0 : i32
    return %arg0, %c0_i32 : i32, i32
  }
}

module attributes {stable_mosaic.version = 11 : i64} {
  func.func @recurrent_mnist_kernel(%arg0: i32, %arg1: i32, %arg2: memref<196x8x128xbf16, #tpu.memory_space<vmem>>, %arg3: memref<128x128xbf16, #tpu.memory_space<vmem>>, %arg4: memref<128x128xbf16, #tpu.memory_space<vmem>>, %arg5: memref<1x128xf32, #tpu.memory_space<vmem>>, %arg6: memref<8x128xf32, #tpu.memory_space<vmem>>, %arg7: memref<8x128xf32, #tpu.memory_space<vmem>>) attributes {dimension_semantics = [#tpu.dimension_semantics<parallel>, #tpu.dimension_semantics<arbitrary>], iteration_bounds = array<i64: 1, 4>, scalar_prefetch = 0 : i64, scratch_operands = 1 : i64, tpu.core_type = #tpu.core_type<tc>, window_params = [{transform_indices = @transform_0, window_bounds = array<i64: 196, 8, 128>}, {pipeline_mode = #tpu.pipeline_mode<synchronous>, transform_indices = @transform_1, window_bounds = array<i64: 128, 128>}, {pipeline_mode = #tpu.pipeline_mode<synchronous>, transform_indices = @transform_2, window_bounds = array<i64: 128, 128>}, {pipeline_mode = #tpu.pipeline_mode<synchronous>, transform_indices = @transform_3, window_bounds = array<i64: 1, 128>}, {transform_indices = @transform_4, window_bounds = array<i64: 8, 128>}]} {
    %c0_i32 = arith.constant 0 : i32
    %0 = arith.cmpi eq, %arg1, %c0_i32 : i32
    %1 = arith.extui %0 : i1 to i32
    %c0_i32_0 = arith.constant 0 : i32
    %2 = arith.cmpi ne, %1, %c0_i32_0 : i32
    scf.if %2 {
      %cst = arith.constant 0.000000e+00 : f32
      %11 = vector.broadcast %cst : f32 to vector<8x128xf32>
      %c0_9 = arith.constant 0 : index
      %c0_10 = arith.constant 0 : index
      %12 = vector.load %arg7[%c0_9, %c0_10] : memref<8x128xf32, #tpu.memory_space<vmem>>, vector<8x128xf32>
      tpu.vector_store %arg7[%c0_9, %c0_10], %11 {strides = array<i32>} : memref<8x128xf32, #tpu.memory_space<vmem>>, vector<8x128xf32>,
    } else {
    }
    %c0 = arith.constant 0 : index
    %c0_1 = arith.constant 0 : index
    %3 = vector.load %arg3[%c0, %c0_1] : memref<128x128xbf16, #tpu.memory_space<vmem>>, vector<128x128xbf16>
    %c0_2 = arith.constant 0 : index
    %c0_3 = arith.constant 0 : index
    %4 = vector.load %arg7[%c0_2, %c0_3] : memref<8x128xf32, #tpu.memory_space<vmem>>, vector<8x128xf32>
    %c0_i32_4 = arith.constant 0 : i32
    %c28_i32 = arith.constant 28 : i32
    %5 = arith.addi %c0_i32_4, %c28_i32 : i32
    %c1_i32 = arith.constant 1 : i32
    %6 = scf.for %arg8 = %c0_i32_4 to %5 step %c1_i32 iter_args(%arg9 = %4) -> (vector<8x128xf32>)  : i32 {
      %c7_i32 = arith.constant 7 : i32
      %11 = arith.muli %arg8, %c7_i32 : i32
      %c0_i32_9 = arith.constant 0 : i32
      %12 = arith.addi %11, %c0_i32_9 : i32
      %13 = arith.index_cast %12 : i32 to index
      %c0_10 = arith.constant 0 : index
      %c0_11 = arith.constant 0 : index
      %14 = vector.load %arg2[%13, %c0_10, %c0_11] : memref<196x8x128xbf16, #tpu.memory_space<vmem>>, vector<1x8x128xbf16>
      %15 = vector.shape_cast %14 : vector<1x8x128xbf16> to vector<8x128xbf16>
      %16 = arith.extf %15 : vector<8x128xbf16> to vector<8x128xf32>
      %17 = arith.truncf %arg9 : vector<8x128xf32> to vector<8x128xbf16>
      %cst = arith.constant dense<0.000000e+00> : vector<8x128xf32>
      %18 = tpu.matmul %17, %3, %cst {dimension_numbers = #tpu.dot_dimension_numbers<[1], [0], [0], [1], [0, 0, 1, 1], [], []>} : vector<8x128xbf16>, vector<128x128xbf16>, vector<8x128xf32> -> vector<8x128xf32>
      %19 = arith.addf %18, %16 : vector<8x128xf32>
      %20 = math.tanh %19 : vector<8x128xf32>
      %c1_i32_12 = arith.constant 1 : i32
      %21 = arith.addi %11, %c1_i32_12 : i32
      %22 = arith.index_cast %21 : i32 to index
      %c0_13 = arith.constant 0 : index
      %c0_14 = arith.constant 0 : index
      %23 = vector.load %arg2[%22, %c0_13, %c0_14] : memref<196x8x128xbf16, #tpu.memory_space<vmem>>, vector<1x8x128xbf16>
      %24 = vector.shape_cast %23 : vector<1x8x128xbf16> to vector<8x128xbf16>
      %25 = arith.extf %24 : vector<8x128xbf16> to vector<8x128xf32>
      %26 = arith.truncf %20 : vector<8x128xf32> to vector<8x128xbf16>
      %cst_15 = arith.constant dense<0.000000e+00> : vector<8x128xf32>
      %27 = tpu.matmul %26, %3, %cst_15 {dimension_numbers = #tpu.dot_dimension_numbers<[1], [0], [0], [1], [0, 0, 1, 1], [], []>} : vector<8x128xbf16>, vector<128x128xbf16>, vector<8x128xf32> -> vector<8x128xf32>
      %28 = arith.addf %27, %25 : vector<8x128xf32>
      %29 = math.tanh %28 : vector<8x128xf32>
      %c2_i32 = arith.constant 2 : i32
      %30 = arith.addi %11, %c2_i32 : i32
      %31 = arith.index_cast %30 : i32 to index
      %c0_16 = arith.constant 0 : index
      %c0_17 = arith.constant 0 : index
      %32 = vector.load %arg2[%31, %c0_16, %c0_17] : memref<196x8x128xbf16, #tpu.memory_space<vmem>>, vector<1x8x128xbf16>
      %33 = vector.shape_cast %32 : vector<1x8x128xbf16> to vector<8x128xbf16>
      %34 = arith.extf %33 : vector<8x128xbf16> to vector<8x128xf32>
      %35 = arith.truncf %29 : vector<8x128xf32> to vector<8x128xbf16>
      %cst_18 = arith.constant dense<0.000000e+00> : vector<8x128xf32>
      %36 = tpu.matmul %35, %3, %cst_18 {dimension_numbers = #tpu.dot_dimension_numbers<[1], [0], [0], [1], [0, 0, 1, 1], [], []>} : vector<8x128xbf16>, vector<128x128xbf16>, vector<8x128xf32> -> vector<8x128xf32>
      %37 = arith.addf %36, %34 : vector<8x128xf32>
      %38 = math.tanh %37 : vector<8x128xf32>
      %c3_i32_19 = arith.constant 3 : i32
      %39 = arith.addi %11, %c3_i32_19 : i32
      %40 = arith.index_cast %39 : i32 to index
      %c0_20 = arith.constant 0 : index
      %c0_21 = arith.constant 0 : index
      %41 = vector.load %arg2[%40, %c0_20, %c0_21] : memref<196x8x128xbf16, #tpu.memory_space<vmem>>, vector<1x8x128xbf16>
      %42 = vector.shape_cast %41 : vector<1x8x128xbf16> to vector<8x128xbf16>
      %43 = arith.extf %42 : vector<8x128xbf16> to vector<8x128xf32>
      %44 = arith.truncf %38 : vector<8x128xf32> to vector<8x128xbf16>
      %cst_22 = arith.constant dense<0.000000e+00> : vector<8x128xf32>
      %45 = tpu.matmul %44, %3, %cst_22 {dimension_numbers = #tpu.dot_dimension_numbers<[1], [0], [0], [1], [0, 0, 1, 1], [], []>} : vector<8x128xbf16>, vector<128x128xbf16>, vector<8x128xf32> -> vector<8x128xf32>
      %46 = arith.addf %45, %43 : vector<8x128xf32>
      %47 = math.tanh %46 : vector<8x128xf32>
      %c4_i32 = arith.constant 4 : i32
      %48 = arith.addi %11, %c4_i32 : i32
      %49 = arith.index_cast %48 : i32 to index
      %c0_23 = arith.constant 0 : index
      %c0_24 = arith.constant 0 : index
      %50 = vector.load %arg2[%49, %c0_23, %c0_24] : memref<196x8x128xbf16, #tpu.memory_space<vmem>>, vector<1x8x128xbf16>
      %51 = vector.shape_cast %50 : vector<1x8x128xbf16> to vector<8x128xbf16>
      %52 = arith.extf %51 : vector<8x128xbf16> to vector<8x128xf32>
      %53 = arith.truncf %47 : vector<8x128xf32> to vector<8x128xbf16>
      %cst_25 = arith.constant dense<0.000000e+00> : vector<8x128xf32>
      %54 = tpu.matmul %53, %3, %cst_25 {dimension_numbers = #tpu.dot_dimension_numbers<[1], [0], [0], [1], [0, 0, 1, 1], [], []>} : vector<8x128xbf16>, vector<128x128xbf16>, vector<8x128xf32> -> vector<8x128xf32>
      %55 = arith.addf %54, %52 : vector<8x128xf32>
      %56 = math.tanh %55 : vector<8x128xf32>
      %c5_i32 = arith.constant 5 : i32
      %57 = arith.addi %11, %c5_i32 : i32
      %58 = arith.index_cast %57 : i32 to index
      %c0_26 = arith.constant 0 : index
      %c0_27 = arith.constant 0 : index
      %59 = vector.load %arg2[%58, %c0_26, %c0_27] : memref<196x8x128xbf16, #tpu.memory_space<vmem>>, vector<1x8x128xbf16>
      %60 = vector.shape_cast %59 : vector<1x8x128xbf16> to vector<8x128xbf16>
      %61 = arith.extf %60 : vector<8x128xbf16> to vector<8x128xf32>
      %62 = arith.truncf %56 : vector<8x128xf32> to vector<8x128xbf16>
      %cst_28 = arith.constant dense<0.000000e+00> : vector<8x128xf32>
      %63 = tpu.matmul %62, %3, %cst_28 {dimension_numbers = #tpu.dot_dimension_numbers<[1], [0], [0], [1], [0, 0, 1, 1], [], []>} : vector<8x128xbf16>, vector<128x128xbf16>, vector<8x128xf32> -> vector<8x128xf32>
      %64 = arith.addf %63, %61 : vector<8x128xf32>
      %65 = math.tanh %64 : vector<8x128xf32>
      %c6_i32 = arith.constant 6 : i32
      %66 = arith.addi %11, %c6_i32 : i32
      %67 = arith.index_cast %66 : i32 to index
      %c0_29 = arith.constant 0 : index
      %c0_30 = arith.constant 0 : index
      %68 = vector.load %arg2[%67, %c0_29, %c0_30] : memref<196x8x128xbf16, #tpu.memory_space<vmem>>, vector<1x8x128xbf16>
      %69 = vector.shape_cast %68 : vector<1x8x128xbf16> to vector<8x128xbf16>
      %70 = arith.extf %69 : vector<8x128xbf16> to vector<8x128xf32>
      %71 = arith.truncf %65 : vector<8x128xf32> to vector<8x128xbf16>
      %cst_31 = arith.constant dense<0.000000e+00> : vector<8x128xf32>
      %72 = tpu.matmul %71, %3, %cst_31 {dimension_numbers = #tpu.dot_dimension_numbers<[1], [0], [0], [1], [0, 0, 1, 1], [], []>} : vector<8x128xbf16>, vector<128x128xbf16>, vector<8x128xf32> -> vector<8x128xf32>
      %73 = arith.addf %72, %70 : vector<8x128xf32>
      %74 = math.tanh %73 : vector<8x128xf32>
      scf.yield %74 : vector<8x128xf32>
    }
    %c28_i32_5 = arith.constant 28 : i32
    %c0_6 = arith.constant 0 : index
    %c0_7 = arith.constant 0 : index
    %7 = vector.load %arg7[%c0_6, %c0_7] : memref<8x128xf32, #tpu.memory_space<vmem>>, vector<8x128xf32>
    tpu.vector_store %arg7[%c0_6, %c0_7], %6 {strides = array<i32>} : memref<8x128xf32, #tpu.memory_space<vmem>>, vector<8x128xf32>,
    %c3_i32 = arith.constant 3 : i32
    %8 = arith.cmpi eq, %arg1, %c3_i32 : i32
    %9 = arith.extui %8 : i1 to i32
    %c0_i32_8 = arith.constant 0 : i32
    %10 = arith.cmpi ne, %9, %c0_i32_8 : i32
    scf.if %10 {
      %11 = arith.truncf %6 : vector<8x128xf32> to vector<8x128xbf16>
      %c0_9 = arith.constant 0 : index
      %c0_10 = arith.constant 0 : index
      %12 = vector.load %arg4[%c0_9, %c0_10] : memref<128x128xbf16, #tpu.memory_space<vmem>>, vector<128x128xbf16>
      %cst = arith.constant dense<0.000000e+00> : vector<8x128xf32>
      %13 = tpu.matmul %11, %12, %cst {dimension_numbers = #tpu.dot_dimension_numbers<[1], [0], [0], [1], [0, 0, 1, 1], [], []>} : vector<8x128xbf16>, vector<128x128xbf16>, vector<8x128xf32> -> vector<8x128xf32>
      %c0_11 = arith.constant 0 : index
      %c0_12 = arith.constant 0 : index
      %14 = vector.load %arg5[%c0_11, %c0_12] : memref<1x128xf32, #tpu.memory_space<vmem>>, vector<1x128xf32>
      %15 = vector.broadcast %14 : vector<1x128xf32> to vector<8x128xf32>
      %16 = arith.addf %13, %15 : vector<8x128xf32>
      %c0_13 = arith.constant 0 : index
      %c0_14 = arith.constant 0 : index
      %17 = vector.load %arg6[%c0_13, %c0_14] : memref<8x128xf32, #tpu.memory_space<vmem>>, vector<8x128xf32>
      tpu.vector_store %arg6[%c0_13, %c0_14], %16 {strides = array<i32>} : memref<8x128xf32, #tpu.memory_space<vmem>>, vector<8x128xf32>,
    } else {
    }
    return
  }
  func.func @transform_0(%arg0: i32, %arg1: i32) -> (i32, i32, i32) {
    %c0_i32 = arith.constant 0 : i32
    %c0_i32_0 = arith.constant 0 : i32
    return %arg1, %arg0, %c0_i32 : i32, i32, i32
  }
  func.func @transform_1(%arg0: i32, %arg1: i32) -> (i32, i32) {
    %c0_i32 = arith.constant 0 : i32
    %c0_i32_0 = arith.constant 0 : i32
    %c0_i32_1 = arith.constant 0 : i32
    return %c0_i32, %c0_i32_0 : i32, i32
  }
  func.func @transform_2(%arg0: i32, %arg1: i32) -> (i32, i32) {
    %c0_i32 = arith.constant 0 : i32
    %c0_i32_0 = arith.constant 0 : i32
    %c0_i32_1 = arith.constant 0 : i32
    return %c0_i32, %c0_i32_0 : i32, i32
  }
  func.func @transform_3(%arg0: i32, %arg1: i32) -> (i32, i32) {
    %c0_i32 = arith.constant 0 : i32
    %c0_i32_0 = arith.constant 0 : i32
    %c0_i32_1 = arith.constant 0 : i32
    return %c0_i32, %c0_i32_0 : i32, i32
  }
  func.func @transform_4(%arg0: i32, %arg1: i32) -> (i32, i32) {
    %c0_i32 = arith.constant 0 : i32
    %c0_i32_0 = arith.constant 0 : i32
    return %arg0, %c0_i32 : i32, i32
  }
}

</mosaic_0001>

<bundles_post_ra>
// kernel: tpu_custom_call.1
= control target key start
LH: loop header
LB: loop body
LE: loop exit
PB: predicated region body
PF: predicated region fallthrough
CT: control target
= control target key end

     0   :  { %9 = vsyncpa [#allocation4], 0  ;;  %s1429_s0 = inlined_call_operand.hbm [shape: bf16[784,8,128], index: 0, kind: input, shape index: {}]   ;;  %s1430_s1 = inlined_call_operand.hbm [shape: bf16[128,128], index: 1, kind: input, shape index: {}]   ;;  %s1431_s2 = inlined_call_operand.hbm [shape: bf16[128,128], index: 2, kind: input, shape index: {}]   ;;  %s1432_s3 = inlined_call_operand.hbm [shape: f32[1,128], index: 3, kind: input, shape index: {}]   ;;  %s1433_s4 = inlined_call_operand.hbm [shape: f32[8,128], index: 4, kind: output, shape index: {}]  }
   0x1   :  { %11 = vsyncpa [#allocation4 + $0x1], 0 }
   0x2   :  { %12 = vsyncpa [#allocation7], 0 }
   0x3   :  { %13 = vsyncpa [#allocation10], 0 }
   0x4   :  { %14 = vsyncpa [#allocation5], 0  ;;  %s1218_s15 = smov 0   ;;  %s1220_s16 = smov 0  }
   0x5   :  { %s1222_s17 = smov 0   ;;  %s1224_s18 = smov 0  }
   0x6   :  { %s1226_s19 = smov 0   ;;  %s1228_s20 = smov 0  }
   0x7 LB: > { %s717_s21 = sadd.s32 4294967295, %s1176_s20   ;;  %p54_p0 = scmp.ne.s32.totalorder %s1160_s16, %s1156_s15  ;;  %s1176_s20 = sphi %s1228_s20, %s20_s20   ;;  %s1172_s19 = sphi %s1226_s19, %s1443_s19   ;;  %s1168_s18 = sphi %s1224_s18, %s1442_s18   ;;  %s1164_s17 = sphi %s1222_s17, %s1441_s17   ;;  %s1160_s16 = sphi %s1220_s16, %s1440_s16   ;;  %s1156_s15 = sphi %s1218_s15, %s1439_s15  }
   0x8   : > { %p1250_p1 = scmp.eq.s32.totalorder %s717_s21, 0  ;;  %p718_p2 = scmp.ge.s32.totalorder %s1176_s20, 1 }
   0x9   : > { %p154_p3 = scmp.lt.s32.totalorder %s1176_s20, 5  ;;  %s165_s26 = sshll.u32 %s1430_s1, 4  ;;  %s166_s26 = int_to_ptr.hbm [resolvable:$true] %s165_s26 }
   0xa   : > { %p1258_p4 = por %p1250_p1, %p54_p0  ;;  %s1186_s28 = smov [#allocation6]  }
   0xb   : > { %p1265_p5 = pnand %p718_p2, %p154_p3  ;;  %s167_s29 = sshll.u32 %s1186_s28, 4  ;;  %s168_s29 = int_to_ptr.vmem [resolvable:$true] %s167_s29 }
   0xc   : > { %s179_s7 = sshll.u32 %s1431_s2, 4  ;;  %s1187_s8 = smov 64   ;;  %s180_s7 = int_to_ptr.hbm [resolvable:$true] %s179_s7 }
   0xd   : > { %p849_p6 = pneg %p1265_p5  ;;  %s1188_s9 = smov 4  }
   0xe   : > { %s1189_s10 = smov [#allocation8]   ;;  %s194_s14 = sshll.u32 %s1432_s3, 4  ;;  %s195_s14 = int_to_ptr.hbm [resolvable:$true] %s194_s14 }
   0xf   : > { %p1273_p7 = pnand %p849_p6, %p1250_p1  ;;  %s181_s11 = sshll.u32 %s1189_s10, 4  ;;  %s182_s11 = int_to_ptr.vmem [resolvable:$true] %s181_s11 }
  0x10   : > { %s1190_s15 = smov [#allocation9]   ;;  %s29_s25 = sadd.s32 1, %s1172_s19 }
  0x11   : > { %852 = dma.hbm_to_vmem [thread:$0]  (!%p1273_p7), %s166_s26, 1024, %s168_s29, [#allocation7], %s1187_s8, %s1187_s8, %s1188_s9  }
  0x12   : > { %855 = dma.hbm_to_vmem [thread:$0]  (!%p1273_p7), %s180_s7, 1024, %s182_s11, [#allocation7], %s1187_s8, %s1187_s8, %s1188_s9  }
  0x13   : > { %s196_s24 = sshll.u32 %s1190_s15, 4  ;;  %p30_p8 = scmp.ge.s32.totalorder %s29_s25, 4  ;;  %s197_s24 = int_to_ptr.vmem [resolvable:$true] %s196_s24 }
  0x14   : > { %858 = dma.hbm_to_vmem [thread:$0]  (!%p1273_p7), %s195_s14, 16, %s197_s24, [#allocation10]  }
  0x15   : > { %s41_s26 = sadd.s32 1, %s1164_s17  ;;  %p48_p9 = scmp.ne.s32.totalorder %s1164_s17, %s1160_s16 }
  0x16   : > { %p49_p10 = scmp.eq.s32.totalorder %s1176_s20, 0  ;;  %s1445_s25 = smov (%p30_p8, %s29_s25), 0 }
  0x17   : > { %p866_p12 = scmp.lt.s32.totalorder %s1176_s20, 4  ;;  %s36_s28 = ssub.s32 %s1172_s19, %s1445_s25 }
  0x18   : > { %p50_p11 = por %p49_p10, %p48_p9  ;;  %s207_s29 = sand.u32 1, %s1164_s17  }
  0x19   : > { %p39_p13 = scmp.eq.s32.totalorder %s36_s28, 0  ;;  %s829_s5 = smul.u32 784, %s207_s29 }
  0x1a   : > { %p860_p0 = pnand %p866_p12, %p50_p11  ;;  %s811_s30 = smul.u32 784, %s1172_s19 }
  0x1b   : > { %s1307_s6 = scalar_select %p39_p13, %s1164_s17, %s41_s26  }
  0x1c   : > { %s211_s7 = scalar_lea.vmem [#allocation3], %s829_s5  ;;  %s217_s13 = scalar_lea.hbm %s1429_s0, %s811_s30 }
  0x1d   : > { %s220_s10 = sshll.u32 %s211_s7, 4  ;;  %s218_s14 = sshll.u32 %s217_s13, 4  ;;  %s221_s10 = int_to_ptr.vmem [resolvable:$true] %s220_s10  ;;  %s219_s14 = int_to_ptr.hbm [resolvable:$true] %s218_s14 }
  0x1e   : > { %s208_s15 = scalar_lea.sflag [#allocation4], %s207_s29  ;;  %232 = sbr.rel (%p1265_p5) target bundleno = 1243 (0x4db), region = 36 }
  0x1f   : > { %862 = dma.hbm_to_vmem [thread:$0]  (!%p860_p0), %s219_s14, 12544, %s221_s10, %s208_s15, %s1187_s8, %s1187_s8, %s1188_s9  }
  0x20   : > { %s234_s24 = sand.u32 (!%p1265_p5), 1, %s1160_s16  }
  0x21   : > { %s1319_s26 = smul.u32 (!%p1265_p5), 784, %s234_s24  ;;  %s235_s28 = scalar_lea.sflag (!%p1265_p5), [#allocation4], %s234_s24 }
  0x23   : > { %s238_s5 = scalar_lea.vmem [#allocation3], %s1319_s26 }
  0x24   : > { %1139 = dma.done.wait (%p1258_p4), %s235_s28, 12544  }
  0x25   : > { %1141 = vsyncadd (%p1258_p4), %s235_s28, 4294954752 }
  0x26   : > { %1143 = dma.done.wait (%p1250_p1), [#allocation7], 2048  }
  0x27   : > { %1145 = vsyncadd (%p1250_p1), [#allocation7], 4294965248 }
  0x28   : > { %1147 = dma.done.wait (%p1250_p1), [#allocation10], 16  }
  0x29   : > { %1149 = vsyncadd (%p1250_p1), [#allocation10], 4294967280  ;;  %p728_p2 = scmp.ne.s32.totalorder %s1168_s18, 0 }
  0x2b   : > { %278 = sbr.rel (%p728_p2) target bundleno = 50 (0x32), region = 56 }
  0x30   : > { %v1191_v0 = vmov 0.0  }
  0x31   : > { %279 = vst [vmem:[#allocation2] sm:$0xff] %v1191_v0 }
  0x32 PF: > { %v1335_v1 = vld [vmem:[#allocation6] sm:$0xf]  ;;  %v1337_v2 = vld [vmem:[#allocation6] sm:$0xf0]  ;;  %v1339_v3 = vld [vmem:[#allocation6 + $0x8] sm:$0xf] }
  0x33   : > { %v1341_v4 = vld [vmem:[#allocation6 + $0x8] sm:$0xf0]  ;;  %v1343_v5 = vld [vmem:[#allocation6 + $0x10] sm:$0xf]  ;;  %v1345_v6 = vld [vmem:[#allocation6 + $0x10] sm:$0xf0] }
  0x34   : > { %v1347_v7 = vld [vmem:[#allocation6 + $0x18] sm:$0xf]  ;;  %v1349_v8 = vld [vmem:[#allocation6 + $0x18] sm:$0xf0]  ;;  %v1351_v9 = vld [vmem:[#allocation6 + $0x20] sm:$0xf] }
  0x35   : > { %v1353_v10 = vld [vmem:[#allocation6 + $0x20] sm:$0xf0]  ;;  %v1355_v11 = vld [vmem:[#allocation6 + $0x28] sm:$0xf]  ;;  %v1357_v12 = vld [vmem:[#allocation6 + $0x28] sm:$0xf0] }
  0x36   : > { %v1359_v13 = vld [vmem:[#allocation6 + $0x30] sm:$0xf]  ;;  %v1361_v14 = vld [vmem:[#allocation6 + $0x30] sm:$0xf0]  ;;  %v1363_v15 = vld [vmem:[#allocation6 + $0x38] sm:$0xf] }
  0x37   : > { %v1365_v16 = vld [vmem:[#allocation6 + $0x38] sm:$0xf0]  ;;  %s1369_s22 = smov 0  }
  0x38   : > { %v296_v17 = vld [vmem:[#allocation2] sm:$0xff]  }
  0x39 LB: >> { %v761_v18 = vor.u32 %v1365_v16, %v1363_v15  ;;  %v757_v19 = vor.u32 %v1361_v14, %v1359_v13  ;;  %v753_v20 = vor.u32 %v1357_v12, %v1355_v11  ;;  %v749_v21 = vor.u32 %v1353_v10, %v1351_v9  ;;  %s820_s23 = smul.u32 28, %s1184_s22  ;;  %s302_s22 = sadd.s32 1, %s1184_s22   ;;  %s1184_s22 = sphi %s1369_s22, %s302_s22   ;;  %v1180_v17 = vphi %v296_v17, %v1438_v17  }
  0x3a   : >> { %v745_v22 = vor.u32 %v1349_v8, %v1347_v7  ;;  %v741_v23 = vor.u32 %v1345_v6, %v1343_v5  ;;  %v737_v24 = vor.u32 %v1341_v4, %v1339_v3  ;;  %v733_v25 = vor.u32 %v1337_v2, %v1335_v1  ;;  %p299_p1 = scmp.ge.s32.totalorder %s302_s22, 28  }
  0x3b   : >> { %358 = vmatpush.bf16.msra.mxu0 %v761_v18  ;;  %378 = vmatpush.bf16.msra.mxu1 %v761_v18  ;;  %v309_v26 = vpack.c.bf16 %v1180_v17, %v1180_v17  ;;  %s1394_s27 = scalar_lea.vmem %s238_s5, %s820_s23 [#allocation3]  ;;  %p774_p3 = scmp.ne.s32.totalorder (%p299_p1), %s1168_s18, 3 }
  0x3c   : >> { %398 = vmatpush.bf16.msra.mxu2 %v761_v18  ;;  %418 = vmatpush.bf16.msra.mxu3 %v761_v18  ;;  %v307_v27 = vld [vmem:[%s1394_s27] sm:$0xff]   ;;  %v765_v40 = vld [vmem:[%s1394_s27 + $0x8] sm:$0xff]   ;;  %v769_v53 = vld [vmem:[%s1394_s27 + $0x10] sm:$0xff]  }
  0x3d   : >> { %v308_v28 = vunpack.c.l.bf16 %v307_v27  ;;  %v376_v34 = vunpack.c.h.bf16 %v307_v27  ;;  %v396_v41 = vunpack.c.l.bf16 %v765_v40  ;;  %v416_v47 = vunpack.c.h.bf16 %v765_v40 }
  0x3e   : >> { %v436_v54 = vunpack.c.l.bf16 %v769_v53  ;;  %v456_v60 = vunpack.c.h.bf16 %v769_v53 }
  0x3f   : >> { %359 = vmatpush.bf16.msra.mxu0 %v757_v19  ;;  %379 = vmatpush.bf16.msra.mxu1 %v757_v19 }
  0x40   : >> { %399 = vmatpush.bf16.msra.mxu2 %v757_v19  ;;  %419 = vmatpush.bf16.msra.mxu3 %v757_v19 }
  0x43   : >> { %360 = vmatpush.bf16.msra.mxu0 %v753_v20  ;;  %380 = vmatpush.bf16.msra.mxu1 %v753_v20 }
  0x44   : >> { %400 = vmatpush.bf16.msra.mxu2 %v753_v20  ;;  %420 = vmatpush.bf16.msra.mxu3 %v753_v20 }
  0x47   : >> { %361 = vmatpush.bf16.msra.mxu0 %v749_v21  ;;  %381 = vmatpush.bf16.msra.mxu1 %v749_v21 }
  0x48   : >> { %401 = vmatpush.bf16.msra.mxu2 %v749_v21  ;;  %421 = vmatpush.bf16.msra.mxu3 %v749_v21 }
  0x4b   : >> { %362 = vmatpush.bf16.msra.mxu0 %v745_v22  ;;  %382 = vmatpush.bf16.msra.mxu1 %v745_v22 }
  0x4c   : >> { %402 = vmatpush.bf16.msra.mxu2 %v745_v22  ;;  %422 = vmatpush.bf16.msra.mxu3 %v745_v22 }
  0x4f   : >> { %363 = vmatpush.bf16.msra.mxu0 %v741_v23  ;;  %383 = vmatpush.bf16.msra.mxu1 %v741_v23 }
  0x50   : >> { %403 = vmatpush.bf16.msra.mxu2 %v741_v23  ;;  %423 = vmatpush.bf16.msra.mxu3 %v741_v23 }
  0x53   : >> { %364 = vmatpush.bf16.msra.mxu0 %v737_v24  ;;  %384 = vmatpush.bf16.msra.mxu1 %v737_v24 }
  0x54   : >> { %404 = vmatpush.bf16.msra.mxu2 %v737_v24  ;;  %424 = vmatpush.bf16.msra.mxu3 %v737_v24 }
  0x57   : >> { %365 = vmatpush.bf16.msra.mxu0 %v733_v25  ;;  %385 = vmatpush.bf16.msra.mxu1 %v733_v25 }
  0x58   : >> { %405 = vmatpush.bf16.msra.mxu2 %v733_v25  ;;  %425 = vmatpush.bf16.msra.mxu3 %v733_v25 }
  0x5a   : >> { %366 = vmatmul.bf16.vlgmr.msra.gmra.mxu0 %v309_v26 }
  0x5b   : >> { %438 = vmatpush.bf16.msrb.mxu0 %v761_v18  ;;  %458 = vmatpush.bf16.msrb.mxu1 %v761_v18 }
  0x5c   : >> { %478 = vmatpush.bf16.msrb.mxu2 %v761_v18  ;;  %v773_v18 = vld [vmem:[%s1394_s27 + $0x18] sm:$0xf] }
  0x5f   : >> { %439 = vmatpush.bf16.msrb.mxu0 %v757_v19  ;;  %459 = vmatpush.bf16.msrb.mxu1 %v757_v19 }
  0x60   : >> { %479 = vmatpush.bf16.msrb.mxu2 %v757_v19  ;;  %v476_v19 = vunpack.c.l.bf16 %v773_v18 }
  0x63   : >> { %440 = vmatpush.bf16.msrb.mxu0 %v753_v20  ;;  %460 = vmatpush.bf16.msrb.mxu1 %v753_v20 }
  0x64   : >> { %480 = vmatpush.bf16.msrb.mxu2 %v753_v20 }
  0x67   : >> { %441 = vmatpush.bf16.msrb.mxu0 %v749_v21  ;;  %461 = vmatpush.bf16.msrb.mxu1 %v749_v21 }
  0x68   : >> { %481 = vmatpush.bf16.msrb.mxu2 %v749_v21 }
  0x6b   : >> { %442 = vmatpush.bf16.msrb.mxu0 %v745_v22  ;;  %462 = vmatpush.bf16.msrb.mxu1 %v745_v22 }
  0x6c   : >> { %482 = vmatpush.bf16.msrb.mxu2 %v745_v22 }
  0x6f   : >> { %443 = vmatpush.bf16.msrb.mxu0 %v741_v23  ;;  %463 = vmatpush.bf16.msrb.mxu1 %v741_v23 }
  0x70   : >> { %483 = vmatpush.bf16.msrb.mxu2 %v741_v23 }
  0x73   : >> { %444 = vmatpush.bf16.msrb.mxu0 %v737_v24  ;;  %464 = vmatpush.bf16.msrb.mxu1 %v737_v24 }
  0x74   : >> { %484 = vmatpush.bf16.msrb.mxu2 %v737_v24 }
  0x77   : >> { %445 = vmatpush.bf16.msrb.mxu0 %v733_v25  ;;  %465 = vmatpush.bf16.msrb.mxu1 %v733_v25 }
  0x78   : >> { %485 = vmatpush.bf16.msrb.mxu2 %v733_v25 }
  0xd7   : >> { %v367_v29 = vpop.f32.mrf.mxu0 }
  0xd8   : >> { %v368_v30 = vadd.f32 %v367_v29, %v308_v28 }
  0xda   : >> { %943 = vtanh.f32 %v368_v30 }
  0xdf   : >> { %v369_v31 = vpop.f32.mrf.mxu0 }
  0xe0   : >> { %v944_v32 = vpop.eup %943 }
  0xe1   : >> { %v377_v33 = vpack.c.bf16 %v944_v32, %v944_v32 }
  0xe3   : >> { %386 = vmatmul.bf16.vlgmr.msra.gmra.mxu1 %v377_v33 }
 0x160   : >> { %v387_v35 = vpop.f32.mrf.mxu1 }
 0x161   : >> { %v388_v36 = vadd.f32 %v387_v35, %v376_v34 }
 0x163   : >> { %945 = vtanh.f32 %v388_v36 }
 0x168   : >> { %v389_v37 = vpop.f32.mrf.mxu1 }
 0x169   : >> { %v946_v38 = vpop.eup %945 }
 0x16a   : >> { %v397_v39 = vpack.c.bf16 %v946_v38, %v946_v38 }
 0x16c   : >> { %406 = vmatmul.bf16.vlgmr.msra.gmra.mxu2 %v397_v39 }
 0x1ef   : >> { %v407_v42 = vpop.f32.mrf.mxu2 }
 0x1f0   : >> { %v408_v43 = vadd.f32 %v407_v42, %v396_v41 }
 0x1f2   : >> { %947 = vtanh.f32 %v408_v43 }
 0x1f7   : >> { %v409_v44 = vpop.f32.mrf.mxu2 }
 0x1f8   : >> { %v948_v45 = vpop.eup %947 }
 0x1f9   : >> { %v417_v46 = vpack.c.bf16 %v948_v45, %v948_v45 }
 0x1fb   : >> { %426 = vmatmul.bf16.vlgmr.msra.gmra.mxu3 %v417_v46 }
 0x27e   : >> { %v427_v48 = vpop.f32.mrf.mxu3 }
 0x27f   : >> { %v428_v49 = vadd.f32 %v427_v48, %v416_v47 }
 0x281   : >> { %949 = vtanh.f32 %v428_v49 }
 0x286   : >> { %v429_v50 = vpop.f32.mrf.mxu3 }
 0x287   : >> { %v950_v51 = vpop.eup %949 }
 0x288   : >> { %v437_v52 = vpack.c.bf16 %v950_v51, %v950_v51 }
 0x28a   : >> { %446 = vmatmul.bf16.vlgmr.msrb.gmra.mxu0 %v437_v52 }
 0x307   : >> { %v447_v55 = vpop.f32.mrf.mxu0 }
 0x308   : >> { %v448_v56 = vadd.f32 %v447_v55, %v436_v54 }
 0x30a   : >> { %951 = vtanh.f32 %v448_v56 }
 0x30f   : >> { %v449_v57 = vpop.f32.mrf.mxu0 }
 0x310   : >> { %v952_v58 = vpop.eup %951 }
 0x311   : >> { %v457_v59 = vpack.c.bf16 %v952_v58, %v952_v58 }
 0x313   : >> { %466 = vmatmul.bf16.vlgmr.msrb.gmra.mxu1 %v457_v59 }
 0x390   : >> { %v467_v61 = vpop.f32.mrf.mxu1 }
 0x391   : >> { %v468_v62 = vadd.f32 %v467_v61, %v456_v60 }
 0x393   : >> { %953 = vtanh.f32 %v468_v62 }
 0x398   : >> { %v469_v63 = vpop.f32.mrf.mxu1 }
 0x399   : >> { %v954_v0 = vpop.eup %953 }
 0x39a   : >> { %v477_v17 = vpack.c.bf16 %v954_v0, %v954_v0 }
 0x39c   : >> { %486 = vmatmul.bf16.vlgmr.msrb.gmra.mxu2 %v477_v17 }
 0x41f   : >> { %v487_v20 = vpop.f32.mrf.mxu2 }
 0x420   : >> { %v488_v21 = vadd.f32 %v487_v20, %v476_v19 }
 0x422   : >> { %955 = vtanh.f32 %v488_v21 }
 0x425   : > { %301 = sbr.rel (!%p299_p1) target bundleno = 57 (0x39), region = 108 }
 0x427   : >> { %v489_v22 = vpop.f32.mrf.mxu2 }
 0x428   : >> { %v956_v23 = vpop.eup %955  }
 0x429   : >> { %v1438_v17 = vmov %v956_v23  ;;  %492 = vst [vmem:[#allocation2] sm:$0xff] (%p299_p1), %v956_v23 }
 0x42a   : > { %496 = sbr.rel (%p774_p3) target bundleno = 1237 (0x4d5), region = 67 }
 0x42f   : > { %v828_v24 = vld [vmem:[#allocation8 + $0x38] sm:$0xff]  ;;  %v827_v25 = vld [vmem:[#allocation8 + $0x30] sm:$0xff]  ;;  %v826_v26 = vld [vmem:[#allocation8 + $0x28] sm:$0xff]  ;;  %v497_v32 = vpack.c.bf16 %v956_v23, %v956_v23 }
 0x430   : > { %566 = vmatpush.bf16.msra.mxu0 %v828_v24  ;;  %v825_v27 = vld [vmem:[#allocation8 + $0x20] sm:$0xff]  ;;  %v824_v28 = vld [vmem:[#allocation8 + $0x18] sm:$0xff]  ;;  %v823_v29 = vld [vmem:[#allocation8 + $0x10] sm:$0xff] }
 0x431   : > { %v822_v30 = vld [vmem:[#allocation8 + $0x8] sm:$0xff]  ;;  %v821_v31 = vld [vmem:[#allocation8] sm:$0xff] }
 0x432   : > { %v957_v1 = vld [vmem:[#allocation9] ss:$0 sm:$0xff] }
 0x434   : > { %567 = vmatpush.bf16.msra.mxu0 %v827_v25 }
 0x438   : > { %568 = vmatpush.bf16.msra.mxu0 %v826_v26 }
 0x43c   : > { %569 = vmatpush.bf16.msra.mxu0 %v825_v27 }
 0x440   : > { %570 = vmatpush.bf16.msra.mxu0 %v824_v28 }
 0x444   : > { %571 = vmatpush.bf16.msra.mxu0 %v823_v29 }
 0x448   : > { %572 = vmatpush.bf16.msra.mxu0 %v822_v30 }
 0x44c   : > { %573 = vmatpush.bf16.msra.mxu0 %v821_v31 }
 0x44f   : > { %574 = vmatmul.bf16.vlgmr.msra.gmra.mxu0 %v497_v32 }
 0x4cc   : > { %v575_v2 = vpop.f32.mrf.mxu0 }
 0x4cd   : > { %v576_v3 = vadd.f32 %v957_v1, %v575_v2 }
 0x4cf   : > { %579 = vst [vmem:[#allocation11] sm:$0xff] %v576_v3 }
 0x4d4   : > { %v577_v4 = vpop.f32.mrf.mxu0 }
 0x4d5 PF: > { %p870_p4 = scmp.eq.s32.totalorder %s717_s21, 3  ;;  %s590_s9 = sshll.u32 %s1433_s4, 4  ;;  %s591_s9 = int_to_ptr.hbm [resolvable:$true] %s590_s9 }
 0x4d6   : > { %s1192_s29 = smov [#allocation11]  }
 0x4d7   : > { %s588_s30 = sshll.u32 %s1192_s29, 4  ;;  %s589_s30 = int_to_ptr.vmem [resolvable:$true] %s588_s30 }
 0x4d8   : > { %846 = dma.vmem_to_hbm [thread:$0]  (%p870_p4), %s589_s30, 128, %s591_s9, [#allocation5]  }
 0x4d9   : > { %1151 = dma.done.wait (%p870_p4), [#allocation5], 128  }
 0x4da   : > { %1153 = vsyncadd (%p870_p4), [#allocation5], 4294967168 }
 0x4db PF: > { %s20_s20 = sadd.s32 1, %s1176_s20   ;;  %s1439_s15 = smov %s1160_s16 }
 0x4dc   : > { %p17_p5 = scmp.ge.s32.totalorder %s20_s20, 6   ;;  %s1440_s16 = smov %s1164_s17 }
 0x4dd   : > { %s1441_s17 = smov %s1307_s6  ;;  %s1442_s18 = smov %s1172_s19 }
 0x4de   : > { %s1443_s19 = smov %s1445_s25  ;;  %19 = sbr.rel (!%p17_p5) target bundleno = 7 (0x7), region = 119 }
 0x4e3   :  { %604 = vsyncpa [#allocation4], 1 }
 0x4e4   :  { %606 = vsyncpa [#allocation4 + $0x1], 1 }
 0x4e5   :  { %607 = vsyncpa [#allocation7], 1 }
 0x4e6   :  { %608 = vsyncpa [#allocation10], 1 }
 0x4e7   :  { %609 = vsyncpa [#allocation5], 1 }
 0x4e8   :  { %611 = vsyncpa [#allocation5 + $0x1], 1 }

// kernel: tpu_custom_call.1
= control target key start
LH: loop header
LB: loop body
LE: loop exit
PB: predicated region body
PF: predicated region fallthrough
CT: control target
= control target key end

     0   :  { %9 = vsyncpa [#allocation4], 0  ;;  %s1429_s0 = inlined_call_operand.hbm [shape: bf16[784,8,128], index: 0, kind: input, shape index: {}]   ;;  %s1430_s1 = inlined_call_operand.hbm [shape: bf16[128,128], index: 1, kind: input, shape index: {}]   ;;  %s1431_s2 = inlined_call_operand.hbm [shape: bf16[128,128], index: 2, kind: input, shape index: {}]   ;;  %s1432_s3 = inlined_call_operand.hbm [shape: f32[1,128], index: 3, kind: input, shape index: {}]   ;;  %s1433_s4 = inlined_call_operand.hbm [shape: f32[8,128], index: 4, kind: output, shape index: {}]  }
   0x1   :  { %11 = vsyncpa [#allocation4 + $0x1], 0 }
   0x2   :  { %12 = vsyncpa [#allocation7], 0 }
   0x3   :  { %13 = vsyncpa [#allocation10], 0 }
   0x4   :  { %14 = vsyncpa [#allocation5], 0  ;;  %s1218_s15 = smov 0   ;;  %s1220_s16 = smov 0  }
   0x5   :  { %s1222_s17 = smov 0   ;;  %s1224_s18 = smov 0  }
   0x6   :  { %s1226_s19 = smov 0   ;;  %s1228_s20 = smov 0  }
   0x7 LB: > { %s717_s21 = sadd.s32 4294967295, %s1176_s20   ;;  %p54_p0 = scmp.ne.s32.totalorder %s1160_s16, %s1156_s15  ;;  %s1176_s20 = sphi %s1228_s20, %s20_s20   ;;  %s1172_s19 = sphi %s1226_s19, %s1443_s19   ;;  %s1168_s18 = sphi %s1224_s18, %s1442_s18   ;;  %s1164_s17 = sphi %s1222_s17, %s1441_s17   ;;  %s1160_s16 = sphi %s1220_s16, %s1440_s16   ;;  %s1156_s15 = sphi %s1218_s15, %s1439_s15  }
   0x8   : > { %p1250_p1 = scmp.eq.s32.totalorder %s717_s21, 0  ;;  %p718_p2 = scmp.ge.s32.totalorder %s1176_s20, 1 }
   0x9   : > { %p154_p3 = scmp.lt.s32.totalorder %s1176_s20, 5  ;;  %s165_s26 = sshll.u32 %s1430_s1, 4  ;;  %s166_s26 = int_to_ptr.hbm [resolvable:$true] %s165_s26 }
   0xa   : > { %p1258_p4 = por %p1250_p1, %p54_p0  ;;  %s1186_s28 = smov [#allocation6]  }
   0xb   : > { %p1265_p5 = pnand %p718_p2, %p154_p3  ;;  %s167_s29 = sshll.u32 %s1186_s28, 4  ;;  %s168_s29 = int_to_ptr.vmem [resolvable:$true] %s167_s29 }
   0xc   : > { %s179_s7 = sshll.u32 %s1431_s2, 4  ;;  %s1187_s8 = smov 64   ;;  %s180_s7 = int_to_ptr.hbm [resolvable:$true] %s179_s7 }
   0xd   : > { %p849_p6 = pneg %p1265_p5  ;;  %s1188_s9 = smov 4  }
   0xe   : > { %s1189_s10 = smov [#allocation8]   ;;  %s194_s14 = sshll.u32 %s1432_s3, 4  ;;  %s195_s14 = int_to_ptr.hbm [resolvable:$true] %s194_s14 }
   0xf   : > { %p1273_p7 = pnand %p849_p6, %p1250_p1  ;;  %s181_s11 = sshll.u32 %s1189_s10, 4  ;;  %s182_s11 = int_to_ptr.vmem [resolvable:$true] %s181_s11 }
  0x10   : > { %s1190_s15 = smov [#allocation9]   ;;  %s29_s25 = sadd.s32 1, %s1172_s19 }
  0x11   : > { %852 = dma.hbm_to_vmem [thread:$0]  (!%p1273_p7), %s166_s26, 1024, %s168_s29, [#allocation7], %s1187_s8, %s1187_s8, %s1188_s9  }
  0x12   : > { %855 = dma.hbm_to_vmem [thread:$0]  (!%p1273_p7), %s180_s7, 1024, %s182_s11, [#allocation7], %s1187_s8, %s1187_s8, %s1188_s9  }
  0x13   : > { %s196_s24 = sshll.u32 %s1190_s15, 4  ;;  %p30_p8 = scmp.ge.s32.totalorder %s29_s25, 4  ;;  %s197_s24 = int_to_ptr.vmem [resolvable:$true] %s196_s24 }
  0x14   : > { %858 = dma.hbm_to_vmem [thread:$0]  (!%p1273_p7), %s195_s14, 16, %s197_s24, [#allocation10]  }
  0x15   : > { %s41_s26 = sadd.s32 1, %s1164_s17  ;;  %p48_p9 = scmp.ne.s32.totalorder %s1164_s17, %s1160_s16 }
  0x16   : > { %p49_p10 = scmp.eq.s32.totalorder %s1176_s20, 0  ;;  %s1445_s25 = smov (%p30_p8, %s29_s25), 0 }
  0x17   : > { %p866_p12 = scmp.lt.s32.totalorder %s1176_s20, 4  ;;  %s36_s28 = ssub.s32 %s1172_s19, %s1445_s25 }
  0x18   : > { %p50_p11 = por %p49_p10, %p48_p9  ;;  %s207_s29 = sand.u32 1, %s1164_s17  }
  0x19   : > { %p39_p13 = scmp.eq.s32.totalorder %s36_s28, 0  ;;  %s829_s5 = smul.u32 784, %s207_s29 }
  0x1a   : > { %p860_p0 = pnand %p866_p12, %p50_p11  ;;  %s811_s30 = smul.u32 784, %s1172_s19 }
  0x1b   : > { %s1307_s6 = scalar_select %p39_p13, %s1164_s17, %s41_s26  }
  0x1c   : > { %s211_s7 = scalar_lea.vmem [#allocation3], %s829_s5  ;;  %s217_s13 = scalar_lea.hbm %s1429_s0, %s811_s30 }
  0x1d   : > { %s220_s10 = sshll.u32 %s211_s7, 4  ;;  %s218_s14 = sshll.u32 %s217_s13, 4  ;;  %s221_s10 = int_to_ptr.vmem [resolvable:$true] %s220_s10  ;;  %s219_s14 = int_to_ptr.hbm [resolvable:$true] %s218_s14 }
  0x1e   : > { %s208_s15 = scalar_lea.sflag [#allocation4], %s207_s29  ;;  %232 = sbr.rel (%p1265_p5) target bundleno = 1243 (0x4db), region = 36 }
  0x1f   : > { %862 = dma.hbm_to_vmem [thread:$0]  (!%p860_p0), %s219_s14, 12544, %s221_s10, %s208_s15, %s1187_s8, %s1187_s8, %s1188_s9  }
  0x20   : > { %s234_s24 = sand.u32 (!%p1265_p5), 1, %s1160_s16  }
  0x21   : > { %s1319_s26 = smul.u32 (!%p1265_p5), 784, %s234_s24  ;;  %s235_s28 = scalar_lea.sflag (!%p1265_p5), [#allocation4], %s234_s24 }
  0x23   : > { %s238_s5 = scalar_lea.vmem [#allocation3], %s1319_s26 }
  0x24   : > { %1139 = dma.done.wait (%p1258_p4), %s235_s28, 12544  }
  0x25   : > { %1141 = vsyncadd (%p1258_p4), %s235_s28, 4294954752 }
  0x26   : > { %1143 = dma.done.wait (%p1250_p1), [#allocation7], 2048  }
  0x27   : > { %1145 = vsyncadd (%p1250_p1), [#allocation7], 4294965248 }
  0x28   : > { %1147 = dma.done.wait (%p1250_p1), [#allocation10], 16  }
  0x29   : > { %1149 = vsyncadd (%p1250_p1), [#allocation10], 4294967280  ;;  %p728_p2 = scmp.ne.s32.totalorder %s1168_s18, 0 }
  0x2b   : > { %278 = sbr.rel (%p728_p2) target bundleno = 50 (0x32), region = 56 }
  0x30   : > { %v1191_v0 = vmov 0.0  }
  0x31   : > { %279 = vst [vmem:[#allocation2] sm:$0xff] %v1191_v0 }
  0x32 PF: > { %v1335_v1 = vld [vmem:[#allocation6] sm:$0xf]  ;;  %v1337_v2 = vld [vmem:[#allocation6] sm:$0xf0]  ;;  %v1339_v3 = vld [vmem:[#allocation6 + $0x8] sm:$0xf] }
  0x33   : > { %v1341_v4 = vld [vmem:[#allocation6 + $0x8] sm:$0xf0]  ;;  %v1343_v5 = vld [vmem:[#allocation6 + $0x10] sm:$0xf]  ;;  %v1345_v6 = vld [vmem:[#allocation6 + $0x10] sm:$0xf0] }
  0x34   : > { %v1347_v7 = vld [vmem:[#allocation6 + $0x18] sm:$0xf]  ;;  %v1349_v8 = vld [vmem:[#allocation6 + $0x18] sm:$0xf0]  ;;  %v1351_v9 = vld [vmem:[#allocation6 + $0x20] sm:$0xf] }
  0x35   : > { %v1353_v10 = vld [vmem:[#allocation6 + $0x20] sm:$0xf0]  ;;  %v1355_v11 = vld [vmem:[#allocation6 + $0x28] sm:$0xf]  ;;  %v1357_v12 = vld [vmem:[#allocation6 + $0x28] sm:$0xf0] }
  0x36   : > { %v1359_v13 = vld [vmem:[#allocation6 + $0x30] sm:$0xf]  ;;  %v1361_v14 = vld [vmem:[#allocation6 + $0x30] sm:$0xf0]  ;;  %v1363_v15 = vld [vmem:[#allocation6 + $0x38] sm:$0xf] }
  0x37   : > { %v1365_v16 = vld [vmem:[#allocation6 + $0x38] sm:$0xf0]  ;;  %s1369_s22 = smov 0  }
  0x38   : > { %v296_v17 = vld [vmem:[#allocation2] sm:$0xff]  }
  0x39 LB: >> { %v761_v18 = vor.u32 %v1365_v16, %v1363_v15  ;;  %v757_v19 = vor.u32 %v1361_v14, %v1359_v13  ;;  %v753_v20 = vor.u32 %v1357_v12, %v1355_v11  ;;  %v749_v21 = vor.u32 %v1353_v10, %v1351_v9  ;;  %s820_s23 = smul.u32 28, %s1184_s22  ;;  %s302_s22 = sadd.s32 1, %s1184_s22   ;;  %s1184_s22 = sphi %s1369_s22, %s302_s22   ;;  %v1180_v17 = vphi %v296_v17, %v1438_v17  }
  0x3a   : >> { %v745_v22 = vor.u32 %v1349_v8, %v1347_v7  ;;  %v741_v23 = vor.u32 %v1345_v6, %v1343_v5  ;;  %v737_v24 = vor.u32 %v1341_v4, %v1339_v3  ;;  %v733_v25 = vor.u32 %v1337_v2, %v1335_v1  ;;  %p299_p1 = scmp.ge.s32.totalorder %s302_s22, 28  }
  0x3b   : >> { %358 = vmatpush.bf16.msra.mxu0 %v761_v18  ;;  %378 = vmatpush.bf16.msra.mxu1 %v761_v18  ;;  %v309_v26 = vpack.c.bf16 %v1180_v17, %v1180_v17  ;;  %s1394_s27 = scalar_lea.vmem %s238_s5, %s820_s23 [#allocation3]  ;;  %p774_p3 = scmp.ne.s32.totalorder (%p299_p1), %s1168_s18, 3 }
  0x3c   : >> { %398 = vmatpush.bf16.msra.mxu2 %v761_v18  ;;  %418 = vmatpush.bf16.msra.mxu3 %v761_v18  ;;  %v307_v27 = vld [vmem:[%s1394_s27] sm:$0xff]   ;;  %v765_v40 = vld [vmem:[%s1394_s27 + $0x8] sm:$0xff]   ;;  %v769_v53 = vld [vmem:[%s1394_s27 + $0x10] sm:$0xff]  }
  0x3d   : >> { %v308_v28 = vunpack.c.l.bf16 %v307_v27  ;;  %v376_v34 = vunpack.c.h.bf16 %v307_v27  ;;  %v396_v41 = vunpack.c.l.bf16 %v765_v40  ;;  %v416_v47 = vunpack.c.h.bf16 %v765_v40 }
  0x3e   : >> { %v436_v54 = vunpack.c.l.bf16 %v769_v53  ;;  %v456_v60 = vunpack.c.h.bf16 %v769_v53 }
  0x3f   : >> { %359 = vmatpush.bf16.msra.mxu0 %v757_v19  ;;  %379 = vmatpush.bf16.msra.mxu1 %v757_v19 }
  0x40   : >> { %399 = vmatpush.bf16.msra.mxu2 %v757_v19  ;;  %419 = vmatpush.bf16.msra.mxu3 %v757_v19 }
  0x43   : >> { %360 = vmatpush.bf16.msra.mxu0 %v753_v20  ;;  %380 = vmatpush.bf16.msra.mxu1 %v753_v20 }
  0x44   : >> { %400 = vmatpush.bf16.msra.mxu2 %v753_v20  ;;  %420 = vmatpush.bf16.msra.mxu3 %v753_v20 }
  0x47   : >> { %361 = vmatpush.bf16.msra.mxu0 %v749_v21  ;;  %381 = vmatpush.bf16.msra.mxu1 %v749_v21 }
  0x48   : >> { %401 = vmatpush.bf16.msra.mxu2 %v749_v21  ;;  %421 = vmatpush.bf16.msra.mxu3 %v749_v21 }
  0x4b   : >> { %362 = vmatpush.bf16.msra.mxu0 %v745_v22  ;;  %382 = vmatpush.bf16.msra.mxu1 %v745_v22 }
  0x4c   : >> { %402 = vmatpush.bf16.msra.mxu2 %v745_v22  ;;  %422 = vmatpush.bf16.msra.mxu3 %v745_v22 }
  0x4f   : >> { %363 = vmatpush.bf16.msra.mxu0 %v741_v23  ;;  %383 = vmatpush.bf16.msra.mxu1 %v741_v23 }
  0x50   : >> { %403 = vmatpush.bf16.msra.mxu2 %v741_v23  ;;  %423 = vmatpush.bf16.msra.mxu3 %v741_v23 }
  0x53   : >> { %364 = vmatpush.bf16.msra.mxu0 %v737_v24  ;;  %384 = vmatpush.bf16.msra.mxu1 %v737_v24 }
  0x54   : >> { %404 = vmatpush.bf16.msra.mxu2 %v737_v24  ;;  %424 = vmatpush.bf16.msra.mxu3 %v737_v24 }
  0x57   : >> { %365 = vmatpush.bf16.msra.mxu0 %v733_v25  ;;  %385 = vmatpush.bf16.msra.mxu1 %v733_v25 }
  0x58   : >> { %405 = vmatpush.bf16.msra.mxu2 %v733_v25  ;;  %425 = vmatpush.bf16.msra.mxu3 %v733_v25 }
  0x5a   : >> { %366 = vmatmul.bf16.vlgmr.msra.gmra.mxu0 %v309_v26 }
  0x5b   : >> { %438 = vmatpush.bf16.msrb.mxu0 %v761_v18  ;;  %458 = vmatpush.bf16.msrb.mxu1 %v761_v18 }
  0x5c   : >> { %478 = vmatpush.bf16.msrb.mxu2 %v761_v18  ;;  %v773_v18 = vld [vmem:[%s1394_s27 + $0x18] sm:$0xf] }
  0x5f   : >> { %439 = vmatpush.bf16.msrb.mxu0 %v757_v19  ;;  %459 = vmatpush.bf16.msrb.mxu1 %v757_v19 }
  0x60   : >> { %479 = vmatpush.bf16.msrb.mxu2 %v757_v19  ;;  %v476_v19 = vunpack.c.l.bf16 %v773_v18 }
  0x63   : >> { %440 = vmatpush.bf16.msrb.mxu0 %v753_v20  ;;  %460 = vmatpush.bf16.msrb.mxu1 %v753_v20 }
  0x64   : >> { %480 = vmatpush.bf16.msrb.mxu2 %v753_v20 }
  0x67   : >> { %441 = vmatpush.bf16.msrb.mxu0 %v749_v21  ;;  %461 = vmatpush.bf16.msrb.mxu1 %v749_v21 }
  0x68   : >> { %481 = vmatpush.bf16.msrb.mxu2 %v749_v21 }
  0x6b   : >> { %442 = vmatpush.bf16.msrb.mxu0 %v745_v22  ;;  %462 = vmatpush.bf16.msrb.mxu1 %v745_v22 }
  0x6c   : >> { %482 = vmatpush.bf16.msrb.mxu2 %v745_v22 }
  0x6f   : >> { %443 = vmatpush.bf16.msrb.mxu0 %v741_v23  ;;  %463 = vmatpush.bf16.msrb.mxu1 %v741_v23 }
  0x70   : >> { %483 = vmatpush.bf16.msrb.mxu2 %v741_v23 }
  0x73   : >> { %444 = vmatpush.bf16.msrb.mxu0 %v737_v24  ;;  %464 = vmatpush.bf16.msrb.mxu1 %v737_v24 }
  0x74   : >> { %484 = vmatpush.bf16.msrb.mxu2 %v737_v24 }
  0x77   : >> { %445 = vmatpush.bf16.msrb.mxu0 %v733_v25  ;;  %465 = vmatpush.bf16.msrb.mxu1 %v733_v25 }
  0x78   : >> { %485 = vmatpush.bf16.msrb.mxu2 %v733_v25 }
  0xd7   : >> { %v367_v29 = vpop.f32.mrf.mxu0 }
  0xd8   : >> { %v368_v30 = vadd.f32 %v367_v29, %v308_v28 }
  0xda   : >> { %943 = vtanh.f32 %v368_v30 }
  0xdf   : >> { %v369_v31 = vpop.f32.mrf.mxu0 }
  0xe0   : >> { %v944_v32 = vpop.eup %943 }
  0xe1   : >> { %v377_v33 = vpack.c.bf16 %v944_v32, %v944_v32 }
  0xe3   : >> { %386 = vmatmul.bf16.vlgmr.msra.gmra.mxu1 %v377_v33 }
 0x160   : >> { %v387_v35 = vpop.f32.mrf.mxu1 }
 0x161   : >> { %v388_v36 = vadd.f32 %v387_v35, %v376_v34 }
 0x163   : >> { %945 = vtanh.f32 %v388_v36 }
 0x168   : >> { %v389_v37 = vpop.f32.mrf.mxu1 }
 0x169   : >> { %v946_v38 = vpop.eup %945 }
 0x16a   : >> { %v397_v39 = vpack.c.bf16 %v946_v38, %v946_v38 }
 0x16c   : >> { %406 = vmatmul.bf16.vlgmr.msra.gmra.mxu2 %v397_v39 }
 0x1ef   : >> { %v407_v42 = vpop.f32.mrf.mxu2 }
 0x1f0   : >> { %v408_v43 = vadd.f32 %v407_v42, %v396_v41 }
 0x1f2   : >> { %947 = vtanh.f32 %v408_v43 }
 0x1f7   : >> { %v409_v44 = vpop.f32.mrf.mxu2 }
 0x1f8   : >> { %v948_v45 = vpop.eup %947 }
 0x1f9   : >> { %v417_v46 = vpack.c.bf16 %v948_v45, %v948_v45 }
 0x1fb   : >> { %426 = vmatmul.bf16.vlgmr.msra.gmra.mxu3 %v417_v46 }
 0x27e   : >> { %v427_v48 = vpop.f32.mrf.mxu3 }
 0x27f   : >> { %v428_v49 = vadd.f32 %v427_v48, %v416_v47 }
 0x281   : >> { %949 = vtanh.f32 %v428_v49 }
 0x286   : >> { %v429_v50 = vpop.f32.mrf.mxu3 }
 0x287   : >> { %v950_v51 = vpop.eup %949 }
 0x288   : >> { %v437_v52 = vpack.c.bf16 %v950_v51, %v950_v51 }
 0x28a   : >> { %446 = vmatmul.bf16.vlgmr.msrb.gmra.mxu0 %v437_v52 }
 0x307   : >> { %v447_v55 = vpop.f32.mrf.mxu0 }
 0x308   : >> { %v448_v56 = vadd.f32 %v447_v55, %v436_v54 }
 0x30a   : >> { %951 = vtanh.f32 %v448_v56 }
 0x30f   : >> { %v449_v57 = vpop.f32.mrf.mxu0 }
 0x310   : >> { %v952_v58 = vpop.eup %951 }
 0x311   : >> { %v457_v59 = vpack.c.bf16 %v952_v58, %v952_v58 }
 0x313   : >> { %466 = vmatmul.bf16.vlgmr.msrb.gmra.mxu1 %v457_v59 }
 0x390   : >> { %v467_v61 = vpop.f32.mrf.mxu1 }
 0x391   : >> { %v468_v62 = vadd.f32 %v467_v61, %v456_v60 }
 0x393   : >> { %953 = vtanh.f32 %v468_v62 }
 0x398   : >> { %v469_v63 = vpop.f32.mrf.mxu1 }
 0x399   : >> { %v954_v0 = vpop.eup %953 }
 0x39a   : >> { %v477_v17 = vpack.c.bf16 %v954_v0, %v954_v0 }
 0x39c   : >> { %486 = vmatmul.bf16.vlgmr.msrb.gmra.mxu2 %v477_v17 }
 0x41f   : >> { %v487_v20 = vpop.f32.mrf.mxu2 }
 0x420   : >> { %v488_v21 = vadd.f32 %v487_v20, %v476_v19 }
 0x422   : >> { %955 = vtanh.f32 %v488_v21 }
 0x425   : > { %301 = sbr.rel (!%p299_p1) target bundleno = 57 (0x39), region = 108 }
 0x427   : >> { %v489_v22 = vpop.f32.mrf.mxu2 }
 0x428   : >> { %v956_v23 = vpop.eup %955  }
 0x429   : >> { %v1438_v17 = vmov %v956_v23  ;;  %492 = vst [vmem:[#allocation2] sm:$0xff] (%p299_p1), %v956_v23 }
 0x42a   : > { %496 = sbr.rel (%p774_p3) target bundleno = 1237 (0x4d5), region = 67 }
 0x42f   : > { %v828_v24 = vld [vmem:[#allocation8 + $0x38] sm:$0xff]  ;;  %v827_v25 = vld [vmem:[#allocation8 + $0x30] sm:$0xff]  ;;  %v826_v26 = vld [vmem:[#allocation8 + $0x28] sm:$0xff]  ;;  %v497_v32 = vpack.c.bf16 %v956_v23, %v956_v23 }
 0x430   : > { %566 = vmatpush.bf16.msra.mxu0 %v828_v24  ;;  %v825_v27 = vld [vmem:[#allocation8 + $0x20] sm:$0xff]  ;;  %v824_v28 = vld [vmem:[#allocation8 + $0x18] sm:$0xff]  ;;  %v823_v29 = vld [vmem:[#allocation8 + $0x10] sm:$0xff] }
 0x431   : > { %v822_v30 = vld [vmem:[#allocation8 + $0x8] sm:$0xff]  ;;  %v821_v31 = vld [vmem:[#allocation8] sm:$0xff] }
 0x432   : > { %v957_v1 = vld [vmem:[#allocation9] ss:$0 sm:$0xff] }
 0x434   : > { %567 = vmatpush.bf16.msra.mxu0 %v827_v25 }
 0x438   : > { %568 = vmatpush.bf16.msra.mxu0 %v826_v26 }
 0x43c   : > { %569 = vmatpush.bf16.msra.mxu0 %v825_v27 }
 0x440   : > { %570 = vmatpush.bf16.msra.mxu0 %v824_v28 }
 0x444   : > { %571 = vmatpush.bf16.msra.mxu0 %v823_v29 }
 0x448   : > { %572 = vmatpush.bf16.msra.mxu0 %v822_v30 }
 0x44c   : > { %573 = vmatpush.bf16.msra.mxu0 %v821_v31 }
 0x44f   : > { %574 = vmatmul.bf16.vlgmr.msra.gmra.mxu0 %v497_v32 }
 0x4cc   : > { %v575_v2 = vpop.f32.mrf.mxu0 }
 0x4cd   : > { %v576_v3 = vadd.f32 %v957_v1, %v575_v2 }
 0x4cf   : > { %579 = vst [vmem:[#allocation11] sm:$0xff] %v576_v3 }
 0x4d4   : > { %v577_v4 = vpop.f32.mrf.mxu0 }
 0x4d5 PF: > { %p870_p4 = scmp.eq.s32.totalorder %s717_s21, 3  ;;  %s590_s9 = sshll.u32 %s1433_s4, 4  ;;  %s591_s9 = int_to_ptr.hbm [resolvable:$true] %s590_s9 }
 0x4d6   : > { %s1192_s29 = smov [#allocation11]  }
 0x4d7   : > { %s588_s30 = sshll.u32 %s1192_s29, 4  ;;  %s589_s30 = int_to_ptr.vmem [resolvable:$true] %s588_s30 }
 0x4d8   : > { %846 = dma.vmem_to_hbm [thread:$0]  (%p870_p4), %s589_s30, 128, %s591_s9, [#allocation5]  }
 0x4d9   : > { %1151 = dma.done.wait (%p870_p4), [#allocation5], 128  }
 0x4da   : > { %1153 = vsyncadd (%p870_p4), [#allocation5], 4294967168 }
 0x4db PF: > { %s20_s20 = sadd.s32 1, %s1176_s20   ;;  %s1439_s15 = smov %s1160_s16 }
 0x4dc   : > { %p17_p5 = scmp.ge.s32.totalorder %s20_s20, 6   ;;  %s1440_s16 = smov %s1164_s17 }
 0x4dd   : > { %s1441_s17 = smov %s1307_s6  ;;  %s1442_s18 = smov %s1172_s19 }
 0x4de   : > { %s1443_s19 = smov %s1445_s25  ;;  %19 = sbr.rel (!%p17_p5) target bundleno = 7 (0x7), region = 119 }
 0x4e3   :  { %604 = vsyncpa [#allocation4], 1 }
 0x4e4   :  { %606 = vsyncpa [#allocation4 + $0x1], 1 }
 0x4e5   :  { %607 = vsyncpa [#allocation7], 1 }
 0x4e6   :  { %608 = vsyncpa [#allocation10], 1 }
 0x4e7   :  { %609 = vsyncpa [#allocation5], 1 }
 0x4e8   :  { %611 = vsyncpa [#allocation5 + $0x1], 1 }

</bundles_post_ra>
